<compile_context>
chip_gen: v7x
topology: tpu7x:2x2x1
jax: 0.10.0
libtpu: 0.0.40
codegen_flags: <defaults>
</compile_context>

<pallas_src>
import jax
import jax.numpy as jnp
from jax.experimental import pallas as pl
from jax.experimental.pallas import tpu as pltpu

# torch.quint8 config
QMIN = 0.0
QMAX = 255.0
OUT_SCALE = 0.25
OUT_ZERO_POINT = 4

_SMALL_BYTES = 512 * 1024          # below this: single whole-array block, no grid


def _requant(x, out_scale, out_zp, qmin, qmax):
    # quantize_per_tensor(inp, 1.0, 0) then dequantize == clamped rounded input
    dq = jnp.clip(jnp.round(x), qmin, qmax)
    # quantized.cat requantizes with the output scale / zero_point; then dequantize
    q2 = jnp.clip(jnp.round(dq / out_scale) + out_zp, qmin, qmax)
    return (q2 - out_zp) * out_scale


def _make_tiled_kernel(out_scale, out_zp, qmin, qmax):
    def kernel(x_ref, o_ref):
        # x_ref: (tr, lane)   o_ref: (2, tr, lane)   (batch dim squeezed away)
        y = _requant(x_ref[...], out_scale, out_zp, qmin, qmax)
        o_ref[0] = y          # first half of the channel concat
        o_ref[1] = y          # second half (same requantized tensor)
    return kernel


def _make_whole_kernel(out_scale, out_zp, qmin, qmax):
    def kernel(x_ref, o_ref):
        # x_ref: (N, M)   o_ref: (N, 2, M)
        y = _requant(x_ref[...], out_scale, out_zp, qmin, qmax)
        o_ref[:, 0, :] = y
        o_ref[:, 1, :] = y
    return kernel


def _vmem_budget():
    """(target input-tile bytes, vmem_limit_bytes) per TPU generation."""
    default_cap = 64 * 1024 * 1024
    try:
        cap = getattr(pltpu.get_tpu_info(), "vmem_capacity_bytes", default_cap)
    except Exception:
        cap = default_cap
    if cap >= 96 * 1024 * 1024:          # v5e / v6e class: 128 MiB physical VMEM
        return 8 * 1024 * 1024, 64 * 1024 * 1024
    # v7x class: 64 MiB physical VMEM -> double-buffered footprint (~6x tile) <= ~24 MiB
    return 4 * 1024 * 1024, 40 * 1024 * 1024


def _choose_row_tile(r, lane, itemsize, target_bytes):
    """Row tile along the flattened axis: multiple of 8 that evenly divides r if possible."""
    max_tr = max(8, target_bytes // (lane * itemsize))
    if r <= max_tr:
        return r                          # full extent: always a legal block
    tr = (max_tr // 8) * 8
    while tr >= 8:
        if r % tr == 0:
            return tr                     # even division -> no masked edge block
        tr -= 8
    return (max_tr // 8) * 8              # fallback: masked edge block on last step


def quantized_cat(inp, out_scale=OUT_SCALE, out_zp=OUT_ZERO_POINT,
                  qmin=QMIN, qmax=QMAX):
    n, c, h, w = inp.shape
    m = c * h * w
    itemsize = inp.dtype.itemsize
    total_bytes = inp.size * itemsize

    # Advisory cost: 1x read + 2x write of the element count, elementwise VPU only.
    cost = pl.CostEstimate(flops=10 * n * m,
                           bytes_accessed=3 * n * m * itemsize,
                           transcendentals=0)

    if total_bytes <= _SMALL_BYTES:
        # Tiny input: single whole-array block, no grid / pipeline overhead.
        kernel = _make_whole_kernel(float(out_scale), float(out_zp),
                                    float(qmin), float(qmax))
        out = pl.pallas_call(
            kernel,
            out_shape=jax.ShapeDtypeStruct((n, 2, m), inp.dtype),
            cost_estimate=cost,
        )(inp.reshape(n, m))
        return out.reshape(n, 2 * c, h, w)

    # Lane-dense view of the per-batch slab: prefer (m//128, 128) so every load/store is
    # a full (8,128) tile for any spatial size; fall back to (C, H*W) if 128 doesn't divide.
    if m % 128 == 0:
        r, lane = m // 128, 128
    else:
        r, lane = c, h * w

    target_tile_bytes, vmem_limit = _vmem_budget()
    tr = _choose_row_tile(r, lane, itemsize, target_tile_bytes)

    kernel = _make_tiled_kernel(float(out_scale), float(out_zp),
                                float(qmin), float(qmax))
    out = pl.pallas_call(
        kernel,
        out_shape=jax.ShapeDtypeStruct((n, 2, r, lane), inp.dtype),
        grid=(n, pl.cdiv(r, tr)),                      # no concat-half grid axis
        in_specs=[
            pl.BlockSpec((pl.Squeezed(), tr, lane), lambda i, j: (i, j, 0)),
        ],
        out_specs=pl.BlockSpec((pl.Squeezed(), 2, tr, lane),
                               lambda i, j: (i, 0, j, 0)),
        compiler_params=pltpu.CompilerParams(
            dimension_semantics=("parallel", "parallel"),
            vmem_limit_bytes=vmem_limit,
        ),
        cost_estimate=cost,
    )(inp.reshape(n, r, lane))

    return out.reshape(n, 2 * c, h, w)       # free row-major reshape back to NCHW


def _reference(inp, out_scale=OUT_SCALE, out_zp=OUT_ZERO_POINT,
               qmin=QMIN, qmax=QMAX):
    y = _requant(inp, out_scale, out_zp, qmin, qmax)
    return jnp.concatenate([y, y], axis=1)


if __name__ == "__main__":
    key = jax.random.PRNGKey(0)
    k0, k1 = jax.random.split(key)

    # Test-spec shape (tiny): exercises the single-block fast path.
    x_small = jax.random.uniform(k0, (2, 4, 16, 16), dtype=jnp.float32) * 20.0
    out_small = jax.block_until_ready(quantized_cat(x_small))
    assert out_small.shape == (2, 8, 16, 16)
    assert jnp.allclose(out_small, _reference(x_small), atol=1e-6), "small mismatch"

    # Larger shape: exercises the tiled, auto-pipelined lane-dense path.
    x_big = jax.random.uniform(k1, (2, 32, 64, 64), dtype=jnp.float32) * 20.0
    out_big = jax.block_until_ready(quantized_cat(x_big))
    assert out_big.shape == (2, 64, 64, 64)
    assert jnp.allclose(out_big, _reference(x_big), atol=1e-6), "tiled mismatch"

    print("KERNEL_OK")
</pallas_src>

<mosaic_0001>
module attributes {stable_mosaic.version = 11 : i64} {
  func.func @kernel(%arg0: memref<2x1024xf32, #tpu.memory_space<vmem>>, %arg1: memref<2x2x1024xf32, #tpu.memory_space<vmem>>) attributes {dimension_semantics = [], scalar_prefetch = 0 : i64, scratch_operands = 0 : i64, tpu.core_type = #tpu.core_type<tc>} {
    %c0 = arith.constant 0 : index
    %c0_0 = arith.constant 0 : index
    %0 = vector.load %arg0[%c0, %c0_0] : memref<2x1024xf32, #tpu.memory_space<vmem>>, vector<2x1024xf32>
    %1 = math.roundeven %0 : vector<2x1024xf32>
    %cst = arith.constant 0.000000e+00 : f32
    %cst_1 = arith.constant 2.550000e+02 : f32
    %2 = vector.broadcast %cst : f32 to vector<2x1024xf32>
    %3 = arith.maximumf %2, %1 : vector<2x1024xf32>
    %4 = vector.broadcast %cst_1 : f32 to vector<2x1024xf32>
    %5 = arith.minimumf %4, %3 : vector<2x1024xf32>
    %cst_2 = arith.constant 2.500000e-01 : f32
    %6 = vector.broadcast %cst_2 : f32 to vector<2x1024xf32>
    %7 = arith.divf %5, %6 : vector<2x1024xf32>
    %8 = math.roundeven %7 : vector<2x1024xf32>
    %cst_3 = arith.constant 4.000000e+00 : f32
    %9 = vector.broadcast %cst_3 : f32 to vector<2x1024xf32>
    %10 = arith.addf %8, %9 : vector<2x1024xf32>
    %cst_4 = arith.constant 0.000000e+00 : f32
    %cst_5 = arith.constant 2.550000e+02 : f32
    %11 = vector.broadcast %cst_4 : f32 to vector<2x1024xf32>
    %12 = arith.maximumf %11, %10 : vector<2x1024xf32>
    %13 = vector.broadcast %cst_5 : f32 to vector<2x1024xf32>
    %14 = arith.minimumf %13, %12 : vector<2x1024xf32>
    %cst_6 = arith.constant 4.000000e+00 : f32
    %15 = vector.broadcast %cst_6 : f32 to vector<2x1024xf32>
    %16 = arith.subf %14, %15 : vector<2x1024xf32>
    %cst_7 = arith.constant 2.500000e-01 : f32
    %17 = vector.broadcast %cst_7 : f32 to vector<2x1024xf32>
    %18 = arith.mulf %16, %17 : vector<2x1024xf32>
    %c0_8 = arith.constant 0 : index
    %c0_9 = arith.constant 0 : index
    %c0_10 = arith.constant 0 : index
    %19 = vector.load %arg1[%c0_8, %c0_9, %c0_10] : memref<2x2x1024xf32, #tpu.memory_space<vmem>>, vector<2x1x1024xf32>
    %20 = vector.shape_cast %19 : vector<2x1x1024xf32> to vector<2x1024xf32>
    %21 = vector.shape_cast %18 : vector<2x1024xf32> to vector<2x1x1024xf32>
    tpu.vector_store %arg1[%c0_8, %c0_9, %c0_10], %21 {strides = array<i32>} : memref<2x2x1024xf32, #tpu.memory_space<vmem>>, vector<2x1x1024xf32>,
    %c0_11 = arith.constant 0 : index
    %c1 = arith.constant 1 : index
    %c0_12 = arith.constant 0 : index
    %22 = vector.load %arg1[%c0_11, %c1, %c0_12] : memref<2x2x1024xf32, #tpu.memory_space<vmem>>, vector<2x1x1024xf32>
    %23 = vector.shape_cast %22 : vector<2x1x1024xf32> to vector<2x1024xf32>
    %24 = vector.shape_cast %18 : vector<2x1024xf32> to vector<2x1x1024xf32>
    tpu.vector_store %arg1[%c0_11, %c1, %c0_12], %24 {strides = array<i32>} : memref<2x2x1024xf32, #tpu.memory_space<vmem>>, vector<2x1x1024xf32>,
    return
  }
}

</mosaic_0001>

<bundles_post_ra>
// kernel: tpu_custom_call.1
= control target key start
LH: loop header
LB: loop body
LE: loop exit
PB: predicated region body
PF: predicated region fallthrough
CT: control target
= control target key end

     0   :  { %6 = vsyncpa [#allocation3], 0  ;;  %s186_s0 = inlined_call_operand.hbm [shape: f32[2,1024], index: 0, kind: input, shape index: {}]   ;;  %s187_s1 = inlined_call_operand.hbm [shape: f32[2,2,1024], index: 1, kind: output, shape index: {}]  }
   0x1   :  { %7 = vsyncpa [#allocation4], 0  ;;  %s147_s6 = smov [#allocation2]   ;;  %s99_s10 = scalar_lea.hbm %s186_s0, 256 }
   0x2   :  { %s14_s7 = sshll.u32 %s147_s6, 4  ;;  %p100_p0 = scmp.ne.s32.totalorder %s186_s0, %s99_s10  ;;  %s15_s7 = int_to_ptr.vmem [resolvable:$true] %s14_s7 }
   0x3   :  { %p103_p1 = scmp.lt.u32.totalorder %s99_s10, %s186_s0 }
   0x5   :  { %p105_p2 = pnand %p103_p1, %p100_p0 }
   0x7   :  { %108 = shalt.err (!%p105_p2)
}
   0x8   :  { %s109_s15 = scalar_lea.vmem %s15_s7, 256  ;;  %p114_p4 = scmp.lt.s32.totalorder %s15_s7, %s15_s7 }
   0x9   :  { %p110_p3 = scmp.ne.s32.totalorder %s15_s7, %s109_s15  ;;  %p115_p5 = scmp.lt.s32.totalorder %s109_s15, %s109_s15 }
   0xb   :  { %p116_p6 = por %p115_p5, %p114_p4 }
   0xd   :  { %p117_p7 = pnand %p116_p6, %p110_p3 }
   0xf   :  { %120 = shalt.err (!%p117_p7)
}
  0x10   :  { %17 = dma.hbm_to_vmem [thread:$0]  %s186_s0, 256, %s15_s7, [#allocation3]  }
  0x11   :  { %143 = dma.done.wait [#allocation3], 256  }
  0x12   :  { %144 = vsyncadd [#allocation3], 4294967040  ;;  %v21_v0 = vld [vmem:[#allocation2] sm:$0xff]  ;;  %v22_v1 = vld [vmem:[#allocation2 + $0x8] sm:$0xff]  ;;  %v148_v12 = vmov 1966171168   ;;  %v49_v14 = vlaneseq }
  0x13   :  { %v90_v2 = vround.rtne.f32 %v21_v0  ;;  %v91_v3 = vround.rtne.f32 %v22_v1  ;;  %v47_v13 = vunpack.c.l.s4 %v148_v12  ;;  %s149_s0 = smov [#allocation5]  }
  0x14   :  { %v50_v20 = vshrl.u32 %v49_v14, 7  ;;  %s76_s18 = sshll.u32 %s149_s0, 4  ;;  %s77_s18 = int_to_ptr.vmem [resolvable:$true] %s76_s18 }
  0x15   :  { %v25_v4 = vmax.f32 %v90_v2, 0.0  ;;  %v26_v5 = vmax.f32 %v91_v3, 0.0  ;;  %v48_v19 = vunpack.c.0.s8 %v47_v13  ;;  %s121_s19 = scalar_lea.vmem %s77_s18, 512  ;;  %p126_p9 = scmp.lt.s32.totalorder %s77_s18, %s77_s18 }
  0x16   :  { %p122_p8 = scmp.ne.s32.totalorder %s77_s18, %s121_s19  ;;  %p127_p10 = scmp.lt.s32.totalorder %s121_s19, %s121_s19 }
  0x17   :  { %v27_v6 = vmin.f32 %v25_v4, 255.0  ;;  %v28_v7 = vmin.f32 %v26_v5, 255.0  ;;  %v51_v25 = vsub.s32 %v48_v19, %v50_v20 }
  0x18   :  { %p128_p11 = por %p127_p10, %p126_p9 }
  0x19   :  { %v30_v8 = vmul.f32 4.0, %v27_v6  ;;  %v31_v9 = vmul.f32 4.0, %v28_v7 }
  0x1a   :  { %p129_p12 = pnand %p128_p11, %p122_p8 }
  0x1b   :  { %v92_v10 = vround.rtne.f32 %v30_v8  ;;  %v93_v11 = vround.rtne.f32 %v31_v9 }
  0x1d   :  { %v34_v15 = vadd.f32 4.0, %v92_v10  ;;  %v35_v16 = vadd.f32 4.0, %v93_v11 }
  0x1f   :  { %v36_v17 = vmax.f32 %v34_v15, 0.0  ;;  %v37_v18 = vmax.f32 %v35_v16, 0.0 }
  0x21   :  { %v38_v21 = vmin.f32 %v36_v17, 255.0  ;;  %v39_v22 = vmin.f32 %v37_v18, 255.0 }
  0x23   :  { %v88_v23 = vadd.f32 -4.0, %v38_v21  ;;  %v89_v24 = vadd.f32 -4.0, %v39_v22 }
  0x25   :  { %v42_v26 = vmul.f32 0.25, %v88_v23  ;;  %v43_v27 = vmul.f32 0.25, %v89_v24 }
  0x27   :  { %v52_v28 = vrot.slane %v42_v26, %v51_v25  ;;  %v59_v29 = vrot.slane %v43_v27, %v51_v25 }
  0x29   :  { %v60_v30 = vcombine.low %v52_v28, %v59_v29  ;;  %v61_v31 = vcombine.high %v52_v28, %v59_v29 }
  0x2b   :  { %64 = vst [vmem:[#allocation5] ss:$2 sm:$0xff] %v60_v30  ;;  %68 = vst [vmem:[#allocation5 + $0x1] ss:$2 sm:$0xff] %v60_v30 }
  0x2c   :  { %66 = vst [vmem:[#allocation5 + $0x10] ss:$2 sm:$0xff] %v61_v31  ;;  %70 = vst [vmem:[#allocation5 + $0x11] ss:$2 sm:$0xff] %v61_v31 }
  0x2d   :  { %132 = shalt.err (!%p129_p12)
}
  0x2e   :  { %s133_s22 = scalar_lea.hbm %s187_s1, 512 }
  0x2f   :  { %p134_p13 = scmp.ne.s32.totalorder %s187_s1, %s133_s22  ;;  %p137_p0 = scmp.lt.u32.totalorder %s133_s22, %s187_s1 }
  0x31   :  { %p139_p1 = pnand %p137_p0, %p134_p13 }
  0x33   :  { %142 = shalt.err (!%p139_p1)
}
  0x34   :  { %s150_s27 = smov 256   ;;  %s151_s28 = smov 16  }
  0x35   :  { %82 = dma.vmem_to_hbm [thread:$0]  %s77_s18, 512, %s187_s1, [#allocation4], %s150_s27, %s150_s27, %s151_s28  }
  0x36   :  { %145 = dma.done.wait [#allocation4], 512  }
  0x37   :  { %146 = vsyncadd [#allocation4], 4294966784 }
  0x38   :  { %86 = vsyncpa [#allocation3], 1 }
  0x39   :  { %87 = vsyncpa [#allocation4], 1 }

</bundles_post_ra>
